<compile_context>
chip_gen: v5e
topology: v5e:2x2
jax: 0.10.0
libtpu: 0.0.40
codegen_flags: <defaults>
</compile_context>

<pallas_src>
import jax
import jax.numpy as jnp
from jax.experimental import pallas as pl
from jax.experimental.pallas import tpu as pltpu


def _round_up(n, m):
    return ((n + m - 1) // m) * m


def mlp_binary_kernel(x_ref, w1_ref, b1_ref, w2_ref, b2_ref, o_ref):
    # MXU matmuls in bf16 with f32 accumulation; elementwise tail in f32.
    x = x_ref[...].astype(jnp.bfloat16)                        # (TB, D)
    w1 = w1_ref[...].astype(jnp.bfloat16)                      # (D, H)
    h = jnp.dot(x, w1, preferred_element_type=jnp.float32)     # (TB, H) f32
    h = jnp.maximum(h + b1_ref[...], 0.0)                      # bias + ReLU (f32)

    w2 = w2_ref[...].astype(jnp.bfloat16)                      # (H, C)
    z = jnp.dot(h.astype(jnp.bfloat16), w2,
                preferred_element_type=jnp.float32)            # (TB, C) f32
    z = z + b2_ref[...]

    # sigmoid(z) = 1 / (1 + exp(-z)); exp runs on the EUP, and the approx
    # reciprocal keeps the divide off the VALU path too.
    # Note: C == 1 makes this a lane-sparse (masked) store; it is the module's
    # declared output, so we keep it — if this kernel is ever fused with
    # downstream work, keep the lane-dense `h` in VMEM instead.
    o_ref[...] = pl.reciprocal(1.0 + jnp.exp(-z), approx=True).astype(o_ref.dtype)


def neural_net_binary_class(x, w1, b1, w2, b2, *, block_b=None):
    """Forward pass of NeuralNetBinaryClass. x: (B, D) f32 -> (B, C) f32."""
    B, D = x.shape
    H = w1.shape[1]
    C = w2.shape[1]

    # Batch tile: multiple of 8 (f32 sublane), capped so the per-step working
    # set (2 double-buffered x/out tiles + resident weights/biases) stays far
    # inside the default scoped VMEM budget on every chip (v5e/v6e/v7x).
    if block_b is None:
        block_b = min(1024, _round_up(B, 8))
    block_b = max(8, _round_up(block_b, 8))
    b_pad = _round_up(B, block_b)
    grid = (b_pad // block_b,)

    if b_pad != B:
        x = jnp.pad(x, ((0, b_pad - B), (0, 0)))  # zero rows, sliced off below

    cost = pl.CostEstimate(
        flops=2 * b_pad * (D * H + H * C),
        transcendentals=b_pad * C,
        bytes_accessed=4 * (b_pad * D + D * H + H + H * C + C + b_pad * C),
    )

    out = pl.pallas_call(
        mlp_binary_kernel,
        out_shape=jax.ShapeDtypeStruct((b_pad, C), jnp.float32),
        grid_spec=pl.GridSpec(
            grid=grid,
            in_specs=[
                # x: one batch tile per grid step (last dim = full D).
                pl.BlockSpec((block_b, D), lambda i: (i, 0)),
                # Weights / biases: same block every step -> resident in VMEM.
                pl.BlockSpec((D, H), lambda i: (0, 0)),
                pl.BlockSpec((1, H), lambda i: (0, 0)),
                pl.BlockSpec((H, C), lambda i: (0, 0)),
                pl.BlockSpec((1, C), lambda i: (0, 0)),
            ],
            out_specs=pl.BlockSpec((block_b, C), lambda i: (i, 0)),
        ),
        compiler_params=pltpu.CompilerParams(
            # Batch steps are independent -> shard across TensorCores on v7x.
            dimension_semantics=("parallel",),
        ),
        cost_estimate=cost,
    )(x, w1, b1, w2, b2)

    return out[:B]


def init_params(key, input_size, hidden_size, num_classes):
    """Deterministic init mimicking PyTorch nn.Linear (uniform +/- 1/sqrt(fan_in))."""
    k1, k2, k3, k4 = jax.random.split(key, 4)
    bound1 = 1.0 / (input_size ** 0.5)
    bound2 = 1.0 / (hidden_size ** 0.5)
    w1 = jax.random.uniform(k1, (input_size, hidden_size), jnp.float32,
                            -bound1, bound1)
    b1 = jax.random.uniform(k2, (1, hidden_size), jnp.float32, -bound1, bound1)
    w2 = jax.random.uniform(k3, (hidden_size, num_classes), jnp.float32,
                            -bound2, bound2)
    b2 = jax.random.uniform(k4, (1, num_classes), jnp.float32, -bound2, bound2)
    return w1, b1, w2, b2


if __name__ == "__main__":
    # Small shapes consistent with the module: binary classifier (num_classes=1).
    B, input_size, hidden_size, num_classes = 64, 16, 32, 1

    key = jax.random.PRNGKey(0)
    kx, kp = jax.random.split(key)
    x = jax.random.normal(kx, (B, input_size), jnp.float32)
    w1, b1, w2, b2 = init_params(kp, input_size, hidden_size, num_classes)

    # block_b=16 forces a multi-step grid (grid=(4,)) so the batch-tiled,
    # resident-weight pipeline is actually exercised even at this demo size;
    # production callers can omit it (defaults to up to 1024 rows/tile).
    y = neural_net_binary_class(x, w1, b1, w2, b2, block_b=16)
    jax.block_until_ready(y)

    # Reference 1: identical bf16-operand / f32-accumulate math in plain JAX.
    h_bf = jnp.dot(x.astype(jnp.bfloat16), w1.astype(jnp.bfloat16),
                   preferred_element_type=jnp.float32) + b1
    h_bf = jnp.maximum(h_bf, 0.0)
    z_bf = jnp.dot(h_bf.astype(jnp.bfloat16), w2.astype(jnp.bfloat16),
                   preferred_element_type=jnp.float32) + b2
    y_bf = jax.nn.sigmoid(z_bf)

    # Reference 2: pure f32 math (original module semantics, looser tol).
    h_f32 = jnp.maximum(x @ w1 + b1, 0.0)
    y_f32 = jax.nn.sigmoid(h_f32 @ w2 + b2)

    assert y.shape == (B, num_classes)
    assert jnp.allclose(y, y_bf, atol=5e-3, rtol=5e-3), \
        float(jnp.max(jnp.abs(y - y_bf)))
    assert jnp.allclose(y, y_f32, atol=5e-2, rtol=5e-2), \
        float(jnp.max(jnp.abs(y - y_f32)))

    print("KERNEL_OK")
</pallas_src>

<mosaic_0001>
module attributes {stable_mosaic.version = 11 : i64} {
  func.func @mlp_binary_kernel(%arg0: i32, %arg1: memref<16x16xf32, #tpu.memory_space<vmem>>, %arg2: memref<16x32xf32, #tpu.memory_space<vmem>>, %arg3: memref<1x32xf32, #tpu.memory_space<vmem>>, %arg4: memref<32x1xf32, #tpu.memory_space<vmem>>, %arg5: memref<1x1xf32, #tpu.memory_space<vmem>>, %arg6: memref<16x1xf32, #tpu.memory_space<vmem>>) attributes {dimension_semantics = [#tpu.dimension_semantics<parallel>], iteration_bounds = array<i64: 4>, scalar_prefetch = 0 : i64, scratch_operands = 0 : i64, tpu.core_type = #tpu.core_type<tc>, window_params = [{transform_indices = @transform_0, window_bounds = array<i64: 16, 16>}, {pipeline_mode = #tpu.pipeline_mode<synchronous>, transform_indices = @transform_1, window_bounds = array<i64: 16, 32>}, {pipeline_mode = #tpu.pipeline_mode<synchronous>, transform_indices = @transform_2, window_bounds = array<i64: 1, 32>}, {pipeline_mode = #tpu.pipeline_mode<synchronous>, transform_indices = @transform_3, window_bounds = array<i64: 32, 1>}, {pipeline_mode = #tpu.pipeline_mode<synchronous>, transform_indices = @transform_4, window_bounds = array<i64: 1, 1>}, {transform_indices = @transform_5, window_bounds = array<i64: 16, 1>}]} {
    %c0 = arith.constant 0 : index
    %c0_0 = arith.constant 0 : index
    %0 = vector.load %arg1[%c0, %c0_0] : memref<16x16xf32, #tpu.memory_space<vmem>>, vector<16x16xf32>
    %1 = arith.truncf %0 : vector<16x16xf32> to vector<16x16xbf16>
    %c0_1 = arith.constant 0 : index
    %c0_2 = arith.constant 0 : index
    %2 = vector.load %arg2[%c0_1, %c0_2] : memref<16x32xf32, #tpu.memory_space<vmem>>, vector<16x32xf32>
    %3 = arith.truncf %2 : vector<16x32xf32> to vector<16x32xbf16>
    %cst = arith.constant dense<0.000000e+00> : vector<16x32xf32>
    %4 = tpu.matmul %1, %3, %cst {dimension_numbers = #tpu.dot_dimension_numbers<[1], [0], [0], [1], [0, 0, 1, 1], [], []>} : vector<16x16xbf16>, vector<16x32xbf16>, vector<16x32xf32> -> vector<16x32xf32>
    %c0_3 = arith.constant 0 : index
    %c0_4 = arith.constant 0 : index
    %5 = vector.load %arg3[%c0_3, %c0_4] : memref<1x32xf32, #tpu.memory_space<vmem>>, vector<1x32xf32>
    %6 = vector.broadcast %5 : vector<1x32xf32> to vector<16x32xf32>
    %7 = arith.addf %4, %6 : vector<16x32xf32>
    %cst_5 = arith.constant 0.000000e+00 : f32
    %8 = vector.broadcast %cst_5 : f32 to vector<16x32xf32>
    %9 = arith.maximumf %7, %8 : vector<16x32xf32>
    %c0_6 = arith.constant 0 : index
    %c0_7 = arith.constant 0 : index
    %10 = vector.load %arg4[%c0_6, %c0_7] : memref<32x1xf32, #tpu.memory_space<vmem>>, vector<32x1xf32>
    %11 = arith.truncf %10 : vector<32x1xf32> to vector<32x1xbf16>
    %12 = arith.truncf %9 : vector<16x32xf32> to vector<16x32xbf16>
    %cst_8 = arith.constant dense<0.000000e+00> : vector<16x1xf32>
    %13 = tpu.matmul %12, %11, %cst_8 {dimension_numbers = #tpu.dot_dimension_numbers<[1], [0], [0], [1], [0, 0, 1, 1], [], []>} : vector<16x32xbf16>, vector<32x1xbf16>, vector<16x1xf32> -> vector<16x1xf32>
    %c0_9 = arith.constant 0 : index
    %c0_10 = arith.constant 0 : index
    %14 = vector.load %arg5[%c0_9, %c0_10] : memref<1x1xf32, #tpu.memory_space<vmem>>, vector<1x1xf32>
    %15 = vector.broadcast %14 : vector<1x1xf32> to vector<16x1xf32>
    %16 = arith.addf %13, %15 : vector<16x1xf32>
    %cst_11 = arith.constant 0.000000e+00 : f32
    %17 = vector.broadcast %cst_11 : f32 to vector<16x1xf32>
    %18 = arith.subf %17, %16 : vector<16x1xf32>
    %19 = math.exp %18 : vector<16x1xf32>
    %cst_12 = arith.constant 1.000000e+00 : f32
    %20 = vector.broadcast %cst_12 : f32 to vector<16x1xf32>
    %21 = arith.addf %20, %19 : vector<16x1xf32>
    %22 = tpu.reciprocal %21 {approx = true} : vector<16x1xf32> -> vector<16x1xf32>
    %c0_13 = arith.constant 0 : index
    %c0_14 = arith.constant 0 : index
    %23 = vector.load %arg6[%c0_13, %c0_14] : memref<16x1xf32, #tpu.memory_space<vmem>>, vector<16x1xf32>
    tpu.vector_store %arg6[%c0_13, %c0_14], %22 {strides = array<i32>} : memref<16x1xf32, #tpu.memory_space<vmem>>, vector<16x1xf32>,
    return
  }
  func.func @transform_0(%arg0: i32) -> (i32, i32) {
    %c0_i32 = arith.constant 0 : i32
    %c0_i32_0 = arith.constant 0 : i32
    return %arg0, %c0_i32 : i32, i32
  }
  func.func @transform_1(%arg0: i32) -> (i32, i32) {
    %c0_i32 = arith.constant 0 : i32
    %c0_i32_0 = arith.constant 0 : i32
    %c0_i32_1 = arith.constant 0 : i32
    return %c0_i32, %c0_i32_0 : i32, i32
  }
  func.func @transform_2(%arg0: i32) -> (i32, i32) {
    %c0_i32 = arith.constant 0 : i32
    %c0_i32_0 = arith.constant 0 : i32
    %c0_i32_1 = arith.constant 0 : i32
    return %c0_i32, %c0_i32_0 : i32, i32
  }
  func.func @transform_3(%arg0: i32) -> (i32, i32) {
    %c0_i32 = arith.constant 0 : i32
    %c0_i32_0 = arith.constant 0 : i32
    %c0_i32_1 = arith.constant 0 : i32
    return %c0_i32, %c0_i32_0 : i32, i32
  }
  func.func @transform_4(%arg0: i32) -> (i32, i32) {
    %c0_i32 = arith.constant 0 : i32
    %c0_i32_0 = arith.constant 0 : i32
    %c0_i32_1 = arith.constant 0 : i32
    return %c0_i32, %c0_i32_0 : i32, i32
  }
  func.func @transform_5(%arg0: i32) -> (i32, i32) {
    %c0_i32 = arith.constant 0 : i32
    %c0_i32_0 = arith.constant 0 : i32
    return %arg0, %c0_i32 : i32, i32
  }
}

</mosaic_0001>

<bundles_post_ra>
// kernel: tpu_custom_call.1
= control target key start
LH: loop header
LB: loop body
LE: loop exit
PB: predicated region body
PF: predicated region fallthrough
CT: control target
= control target key end

     0   :  { %s431_s20 = smov 0   ;;  %s476_s0 = inlined_call_operand.vmem [shape: f32[64,16], index: 0, kind: input, shape index: {}]   ;;  %s477_s1 = inlined_call_operand.vmem [shape: f32[16,32], index: 1, kind: input, shape index: {}]   ;;  %s478_s2 = inlined_call_operand.vmem [shape: f32[1,32], index: 2, kind: input, shape index: {}]   ;;  %s479_s3 = inlined_call_operand.vmem [shape: f32[32,1], index: 3, kind: input, shape index: {}]   ;;  %s480_s4 = inlined_call_operand.<no memory space> [shape: f32[1,1], index: 4, kind: input, shape index: {}]   ;;  %s481_s5 = inlined_call_operand.vmem [shape: f32[64,1], index: 5, kind: output, shape index: {}]  }
   0x1   :  { %v10_v0 = vstv %s480_s4 }
   0x2   :  { %11 = vst [vmem:[#allocation2] sm:$0x1] %v10_v0 }
   0x3 LB: > { %s359_s21 = sadd.s32 4294967295, %s396_s20   ;;  %p363_p0 = scmp.ge.s32.totalorder %s396_s20, 1  ;;  %s396_s20 = sphi %s431_s20, %s17_s20  }
   0x4   : > { %p190_p1 = scmp.lt.s32.totalorder %s396_s20, 5 }
   0x6   : > { %p191_p2 = pnand %p363_p0, %p190_p1 }
   0x7   : > { %s364_s25 = sshll.u32 (!%p191_p2), %s359_s21, 1 }
   0x8   : > { %194 = sbr.rel (%p191_p2) target bundleno = 316 (0x13c), region = 40  ;;  %p219_p3 = scmp.lt.s32.totalorder (!%p191_p2), %s364_s25, 7 }
   0xd   : > { %v234_v1 = vld [vmem:[%s477_s1] sm:$0xff]  ;;  %v235_v2 = vld [vmem:[%s477_s1 + $0x8] sm:$0xff]  ;;  %s483_s25 = smov (!%p219_p3, %s364_s25), 7  ;;  %vm241_vm0 = vcmask 130048   ;;  %v263_v7 = vld [vmem:[%s479_s3 + $0x10] sm:$0xff]  ;;  %vm272_vm1 = vcmask 261120  }
   0xe   : > { %v236_v3 = vpack.c.bf16 %v235_v2, %v234_v1  ;;  %s365_s26 = sshll.u32 %s483_s25, 3  ;;  %v264_v8 = vld [vmem:[%s479_s3 + $0x18] sm:$0xff]  ;;  %v261_v10 = vld [vmem:[%s479_s3] sm:$0xff]  ;;  %v262_v11 = vld [vmem:[%s479_s3 + $0x8] sm:$0xff]  ;;  %vm300_vm2 = vcmask 7168  }
   0xf   : > { %s222_s29 = scalar_lea.vmem %s476_s0, %s365_s26  ;;  %v266_v9 = vpack.c.bf16 %v264_v8, %v263_v7  ;;  %v265_v12 = vpack.c.bf16 %v262_v11, %v261_v10  ;;  %v380_v14 = vld [vmem:[%s478_s2] ss:$0 sm:$0xff]  ;;  %s228_s17 = scalar_lea.vmem %s481_s5, %s365_s26 }
  0x10   : > { %252 = vmatpush.bf16.msra.mxu0 %v236_v3  ;;  %v231_v4 = vld [vmem:[%s222_s29] sm:$0xff]  ;;  %v232_v5 = vld [vmem:[%s222_s29 + $0x8] sm:$0xff] }
  0x11   : > { %v233_v6 = vpack.c.bf16 %v232_v5, %v231_v4  ;;  %282 = vmatpush.bf16.msra.mxu1 %v266_v9  ;;  %v381_v21 = vld [vmem:[#allocation2] ss:$0 sm:$0xff] }
  0x13   : > { %368 = vmatmul.msk.bf16.vlgmr.msra.gmra.mxu0 %vm241_vm0, %v233_v6 }
  0x15   : > { %283 = vmatpush.bf16.msra.mxu1 %v265_v12 }
  0x90   : > { %v254_v13 = vpop.f32.mrf.mxu0 }
  0x91   : > { %v255_v15 = vadd.f32 %v380_v14, %v254_v13 }
  0x93   : > { %v259_v18 = vmax.f32 %v255_v15, 0.0 }
  0x98   : > { %v256_v16 = vpop.f32.mrf.mxu0 }
  0x99   : > { %v257_v17 = vadd.f32 %v380_v14, %v256_v16 }
  0x9b   : > { %v260_v19 = vmax.f32 %v257_v17, 0.0 }
  0x9d   : > { %v267_v20 = vpack.c.bf16 %v260_v19, %v259_v18 }
  0x9f   : > { %369 = vmatmul.msk.bf16.vlgmr.msra.gmra.mxu1 %vm272_vm1, %v267_v20 }
 0x11c   : > { %v285_v22 = vpop.f32.mrf.mxu1 }
 0x11d   : > { %v286_v23 = vadd.f32 %v381_v21, %v285_v22 }
 0x11f   : > { %v290_v24 = vsub.f32 0.0, %v286_v23 }
 0x121   : > { %v292_v25 = vmul.f32 1.442695, %v290_v24 }
 0x123   : > { %382 = vpow2.f32 %v292_v25 }
 0x124   : > { %v287_v26 = vpop.f32.mrf.mxu1 }
 0x125   : > { %v288_v27 = vadd.f32 %v381_v21, %v287_v26 }
 0x127   : > { %v291_v28 = vsub.f32 0.0, %v288_v27 }
 0x129   : > { %v383_v29 = vpop.eup %382  ;;  %v294_v30 = vmul.f32 1.442695, %v291_v28 }
 0x12a   : > { %v296_v31 = vadd.f32 1.0, %v383_v29 }
 0x12b   : > { %384 = vpow2.f32 %v294_v30 }
 0x12c   : > { %386 = vrcp.f32 %v296_v31 }
 0x131   : > { %v385_v32 = vpop.eup %384 }
 0x132   : > { %v387_v33 = vpop.eup %386  ;;  %v297_v34 = vadd.f32 1.0, %v385_v32 }
 0x133   : > { %301 = vst.msk [vmem:[%s228_s17] sm:$0xff] %vm300_vm2, %v387_v33 }
 0x134   : > { %388 = vrcp.f32 %v297_v34 }
 0x13a   : > { %v389_v35 = vpop.eup %388 }
 0x13b   : > { %302 = vst.msk [vmem:[%s228_s17 + $0x8] sm:$0xff] %vm300_vm2, %v389_v35 }
 0x13c PF: > { %s17_s20 = sadd.s32 1, %s396_s20  }
 0x13d   : > { %p14_p4 = scmp.ge.s32.totalorder %s17_s20, 6  }
 0x13f   :  { %16 = sbr.rel (!%p14_p4) target bundleno = 3 (0x3), region = 70 }

</bundles_post_ra>
